<compile_context>
chip_gen: v6e
topology: v6e:2x2x1
jax: 0.10.0
libtpu: 0.0.40
codegen_flags: <defaults>
</compile_context>

<pallas_src>
import functools

import jax
import jax.numpy as jnp
from jax.experimental import pallas as pl


def mha_kernel(xq_ref, xk_ref, xv_ref,
               wq_ref, bq_ref, wk_ref, bk_ref, wv_ref, bv_ref,
               wo_ref, bo_ref,
               out_ref, *, n_head, dim_head):
    """Single-step kernel: whole (B, S, D) problem in VMEM, batch folded into rows."""
    B, S, D = xq_ref.shape
    H, Dh = n_head, dim_head
    E = H * Dh

    # Fold batch into matmul rows: (B*S, D) @ (D, E).  B*S = 16 rows keeps the
    # MXU sublane fill at 2x the per-batch version; E = 128 stays lane-dense.
    xq = xq_ref[...].reshape(B * S, D)
    xk = xk_ref[...].reshape(B * S, D)
    xv = xv_ref[...].reshape(B * S, D)

    # Linear projections (y = x @ W + b).  q's dim_head**-0.5 scale is already
    # folded into wq/bq at parameter-init time.
    q = jnp.dot(xq, wq_ref[...], preferred_element_type=jnp.float32) + bq_ref[...]
    k = jnp.dot(xk, wk_ref[...], preferred_element_type=jnp.float32) + bk_ref[...]
    v = jnp.dot(xv, wv_ref[...], preferred_element_type=jnp.float32) + bv_ref[...]

    # Per-head attention, batched over B with rank-3 einsums (single batch dim,
    # the Mosaic-friendly pattern).  Static H=4 loop with 32-lane head slices.
    head_outs = []
    for h in range(H):
        lo = h * Dh
        qh = q[:, lo:lo + Dh].reshape(B, S, Dh)
        kh = k[:, lo:lo + Dh].reshape(B, S, Dh)
        vh = v[:, lo:lo + Dh].reshape(B, S, Dh)

        s = jnp.einsum('bqd,bkd->bqk', qh, kh,
                       preferred_element_type=jnp.float32)        # (B, S, S)
        m = jnp.max(s, axis=-1, keepdims=True)
        e = jnp.exp(s - m)
        p = e / jnp.sum(e, axis=-1, keepdims=True)                # exact softmax
        o = jnp.einsum('bqk,bkd->bqd', p, vh,
                       preferred_element_type=jnp.float32)        # (B, S, Dh)
        head_outs.append(o.reshape(B * S, Dh))

    o = jnp.concatenate(head_outs, axis=-1)                       # (B*S, E)

    # Output projection (MHA out_proj): (B*S, E) @ (E, E) + bo.
    y = jnp.dot(o, wo_ref[...], preferred_element_type=jnp.float32) + bo_ref[...]

    # Write (B, E, S) directly: one small in-kernel XLU transpose per batch
    # instead of a separate post-kernel XLA transpose dispatch.
    out_ref[...] = jnp.transpose(y.reshape(B, S, E), (0, 2, 1))


def model_forward(xq, xk, xv, params, *, n_head, dim_head):
    """xq/xk/xv: (B, S, D) float32.  Returns (B, n_head*dim_head, S)."""
    B, S, D = xq.shape
    H, Dh = n_head, dim_head
    E = H * Dh

    # Single kernel invocation, full arrays resident in VMEM (<1 MiB total),
    # no grid => no per-step pipeline overhead and no redundant double-buffering
    # of the grid-invariant weights.
    return pl.pallas_call(
        functools.partial(mha_kernel, n_head=H, dim_head=Dh),
        out_shape=jax.ShapeDtypeStruct((B, E, S), jnp.float32),
    )(xq, xk, xv,
      params["wq"], params["bq"], params["wk"], params["bk"],
      params["wv"], params["bv"], params["wo"], params["bo"])


def reference_forward(xq, xk, xv, params, *, n_head, dim_head):
    """Pure-JAX reference for correctness checking."""
    B, S, D = xq.shape
    H, Dh = n_head, dim_head
    E = H * Dh
    q = xq @ params["wq"] + params["bq"]          # scale already folded in
    k = xk @ params["wk"] + params["bk"]
    v = xv @ params["wv"] + params["bv"]
    qh = q.reshape(B, S, H, Dh)
    kh = k.reshape(B, S, H, Dh)
    vh = v.reshape(B, S, H, Dh)
    s = jnp.einsum('bqhd,bkhd->bhqk', qh, kh)
    p = jax.nn.softmax(s, axis=-1)
    o = jnp.einsum('bhqk,bkhd->bqhd', p, vh).reshape(B, S, E)
    y = o @ params["wo"] + params["bo"]
    return jnp.transpose(y, (0, 2, 1))            # (B, E, S)


def init_params(key, d_model, n_head, dim_head):
    E = n_head * dim_head
    ks = jax.random.split(key, 8)
    s_in = 1.0 / (d_model ** 0.5)
    s_out = 1.0 / (E ** 0.5)
    scale = float(dim_head) ** -0.5
    return {
        # Weights stored pre-transposed so y = x @ W + b (torch Linear is x @ W^T).
        # The q-projection's dim_head**-0.5 scale is folded into wq/bq here
        # (one-time constant fold; q = (x Wq + bq)*scale == x (Wq*scale) + bq*scale).
        # Biases stored as (1, E) so no per-call reshapes are needed.
        "wq": jax.random.normal(ks[0], (d_model, E), jnp.float32) * (s_in * scale),
        "bq": jax.random.normal(ks[1], (1, E), jnp.float32) * (0.01 * scale),
        "wk": jax.random.normal(ks[2], (d_model, E), jnp.float32) * s_in,
        "bk": jax.random.normal(ks[3], (1, E), jnp.float32) * 0.01,
        "wv": jax.random.normal(ks[4], (d_model, E), jnp.float32) * s_in,
        "bv": jax.random.normal(ks[5], (1, E), jnp.float32) * 0.01,
        "wo": jax.random.normal(ks[6], (E, E), jnp.float32) * s_out,
        "bo": jax.random.normal(ks[7], (1, E), jnp.float32) * 0.01,
    }


if __name__ == "__main__":
    B, S = 2, 8
    d_model = 128
    n_head = 4
    dim_head = d_model // n_head  # 32

    key = jax.random.PRNGKey(0)
    kq, kk, kv, kp = jax.random.split(key, 4)
    x_emb_q = jax.random.normal(kq, (B, S, d_model), jnp.float32)
    x_emb_k = jax.random.normal(kk, (B, S, d_model), jnp.float32)
    x_emb_v = jax.random.normal(kv, (B, S, d_model), jnp.float32)

    params = init_params(kp, d_model, n_head, dim_head)

    out = model_forward(x_emb_q, x_emb_k, x_emb_v,
                        params, n_head=n_head, dim_head=dim_head)
    out = jax.block_until_ready(out)

    assert out.shape == (B, n_head * dim_head, S), out.shape
    assert bool(jnp.all(jnp.isfinite(out)))

    ref = reference_forward(x_emb_q, x_emb_k, x_emb_v,
                            params, n_head=n_head, dim_head=dim_head)
    assert bool(jnp.allclose(out, ref, rtol=2e-5, atol=2e-5)), \
        float(jnp.max(jnp.abs(out - ref)))

    print("KERNEL_OK")
</pallas_src>

<mosaic_0001>
module attributes {stable_mosaic.version = 11 : i64} {
  func.func @mha_kernel(%arg0: memref<2x8x128xf32, #tpu.memory_space<vmem>>, %arg1: memref<2x8x128xf32, #tpu.memory_space<vmem>>, %arg2: memref<2x8x128xf32, #tpu.memory_space<vmem>>, %arg3: memref<128x128xf32, #tpu.memory_space<vmem>>, %arg4: memref<1x128xf32, #tpu.memory_space<vmem>>, %arg5: memref<128x128xf32, #tpu.memory_space<vmem>>, %arg6: memref<1x128xf32, #tpu.memory_space<vmem>>, %arg7: memref<128x128xf32, #tpu.memory_space<vmem>>, %arg8: memref<1x128xf32, #tpu.memory_space<vmem>>, %arg9: memref<128x128xf32, #tpu.memory_space<vmem>>, %arg10: memref<1x128xf32, #tpu.memory_space<vmem>>, %arg11: memref<2x128x8xf32, #tpu.memory_space<vmem>>) attributes {dimension_semantics = [], scalar_prefetch = 0 : i64, scratch_operands = 0 : i64, tpu.core_type = #tpu.core_type<tc>} {
    %c0 = arith.constant 0 : index
    %c0_0 = arith.constant 0 : index
    %c0_1 = arith.constant 0 : index
    %0 = vector.load %arg0[%c0, %c0_0, %c0_1] : memref<2x8x128xf32, #tpu.memory_space<vmem>>, vector<2x8x128xf32>
    %1 = vector.shape_cast %0 : vector<2x8x128xf32> to vector<16x128xf32>
    %c0_2 = arith.constant 0 : index
    %c0_3 = arith.constant 0 : index
    %c0_4 = arith.constant 0 : index
    %2 = vector.load %arg1[%c0_2, %c0_3, %c0_4] : memref<2x8x128xf32, #tpu.memory_space<vmem>>, vector<2x8x128xf32>
    %3 = vector.shape_cast %2 : vector<2x8x128xf32> to vector<16x128xf32>
    %c0_5 = arith.constant 0 : index
    %c0_6 = arith.constant 0 : index
    %c0_7 = arith.constant 0 : index
    %4 = vector.load %arg2[%c0_5, %c0_6, %c0_7] : memref<2x8x128xf32, #tpu.memory_space<vmem>>, vector<2x8x128xf32>
    %5 = vector.shape_cast %4 : vector<2x8x128xf32> to vector<16x128xf32>
    %c0_8 = arith.constant 0 : index
    %c0_9 = arith.constant 0 : index
    %6 = vector.load %arg3[%c0_8, %c0_9] : memref<128x128xf32, #tpu.memory_space<vmem>>, vector<128x128xf32>
    %cst = arith.constant dense<0.000000e+00> : vector<16x128xf32>
    %7 = tpu.matmul %1, %6, %cst {dimension_numbers = #tpu.dot_dimension_numbers<[1], [0], [0], [1], [0, 0, 1, 1], [], []>} : vector<16x128xf32>, vector<128x128xf32>, vector<16x128xf32> -> vector<16x128xf32>
    %c0_10 = arith.constant 0 : index
    %c0_11 = arith.constant 0 : index
    %8 = vector.load %arg4[%c0_10, %c0_11] : memref<1x128xf32, #tpu.memory_space<vmem>>, vector<1x128xf32>
    %9 = vector.broadcast %8 : vector<1x128xf32> to vector<16x128xf32>
    %10 = arith.addf %7, %9 : vector<16x128xf32>
    %c0_12 = arith.constant 0 : index
    %c0_13 = arith.constant 0 : index
    %11 = vector.load %arg5[%c0_12, %c0_13] : memref<128x128xf32, #tpu.memory_space<vmem>>, vector<128x128xf32>
    %cst_14 = arith.constant dense<0.000000e+00> : vector<16x128xf32>
    %12 = tpu.matmul %3, %11, %cst_14 {dimension_numbers = #tpu.dot_dimension_numbers<[1], [0], [0], [1], [0, 0, 1, 1], [], []>} : vector<16x128xf32>, vector<128x128xf32>, vector<16x128xf32> -> vector<16x128xf32>
    %c0_15 = arith.constant 0 : index
    %c0_16 = arith.constant 0 : index
    %13 = vector.load %arg6[%c0_15, %c0_16] : memref<1x128xf32, #tpu.memory_space<vmem>>, vector<1x128xf32>
    %14 = vector.broadcast %13 : vector<1x128xf32> to vector<16x128xf32>
    %15 = arith.addf %12, %14 : vector<16x128xf32>
    %c0_17 = arith.constant 0 : index
    %c0_18 = arith.constant 0 : index
    %16 = vector.load %arg7[%c0_17, %c0_18] : memref<128x128xf32, #tpu.memory_space<vmem>>, vector<128x128xf32>
    %cst_19 = arith.constant dense<0.000000e+00> : vector<16x128xf32>
    %17 = tpu.matmul %5, %16, %cst_19 {dimension_numbers = #tpu.dot_dimension_numbers<[1], [0], [0], [1], [0, 0, 1, 1], [], []>} : vector<16x128xf32>, vector<128x128xf32>, vector<16x128xf32> -> vector<16x128xf32>
    %c0_20 = arith.constant 0 : index
    %c0_21 = arith.constant 0 : index
    %18 = vector.load %arg8[%c0_20, %c0_21] : memref<1x128xf32, #tpu.memory_space<vmem>>, vector<1x128xf32>
    %19 = vector.broadcast %18 : vector<1x128xf32> to vector<16x128xf32>
    %20 = arith.addf %17, %19 : vector<16x128xf32>
    %21 = vector.extract_strided_slice %10 {offsets = [0, 0], sizes = [16, 32], strides = [1, 1]} : vector<16x128xf32> to vector<16x32xf32>
    %22 = vector.shape_cast %21 : vector<16x32xf32> to vector<2x8x32xf32>
    %23 = vector.extract_strided_slice %15 {offsets = [0, 0], sizes = [16, 32], strides = [1, 1]} : vector<16x128xf32> to vector<16x32xf32>
    %24 = vector.shape_cast %23 : vector<16x32xf32> to vector<2x8x32xf32>
    %25 = vector.extract_strided_slice %20 {offsets = [0, 0], sizes = [16, 32], strides = [1, 1]} : vector<16x128xf32> to vector<16x32xf32>
    %26 = vector.shape_cast %25 : vector<16x32xf32> to vector<2x8x32xf32>
    "tpu.trace_start"() <{level = 10 : i32, message = "bqd,bkd->bqk"}> : () -> ()
    %cst_22 = arith.constant dense<0.000000e+00> : vector<2x8x8xf32>
    %27 = tpu.matmul %22, %24, %cst_22 {dimension_numbers = #tpu.dot_dimension_numbers<[2], [2], [1], [1], [0, 0, 0, 1, 1, 1], [0], [0]>} : vector<2x8x32xf32>, vector<2x8x32xf32>, vector<2x8x8xf32> -> vector<2x8x8xf32>
    "tpu.trace_stop"() : () -> ()
    %cst_23 = arith.constant dense<0xFF800000> : vector<2x8xf32>
    %28 = vector.multi_reduction <maximumf>, %27, %cst_23 [2] : vector<2x8x8xf32> to vector<2x8xf32>
    %29 = vector.shape_cast %28 : vector<2x8xf32> to vector<2x8x1xf32>
    %30 = vector.broadcast %29 : vector<2x8x1xf32> to vector<2x8x8xf32>
    %31 = arith.subf %27, %30 : vector<2x8x8xf32>
    %32 = math.exp %31 : vector<2x8x8xf32>
    %cst_24 = arith.constant dense<0.000000e+00> : vector<2x8xf32>
    %33 = vector.multi_reduction <add>, %32, %cst_24 [2] : vector<2x8x8xf32> to vector<2x8xf32>
    %34 = vector.shape_cast %33 : vector<2x8xf32> to vector<2x8x1xf32>
    %35 = vector.broadcast %34 : vector<2x8x1xf32> to vector<2x8x8xf32>
    %36 = arith.divf %32, %35 : vector<2x8x8xf32>
    "tpu.trace_start"() <{level = 10 : i32, message = "bqk,bkd->bqd"}> : () -> ()
    %cst_25 = arith.constant dense<0.000000e+00> : vector<2x8x32xf32>
    %37 = tpu.matmul %36, %26, %cst_25 {dimension_numbers = #tpu.dot_dimension_numbers<[2], [1], [1], [2], [0, 0, 0, 1, 1, 2], [0], [0]>} : vector<2x8x8xf32>, vector<2x8x32xf32>, vector<2x8x32xf32> -> vector<2x8x32xf32>
    "tpu.trace_stop"() : () -> ()
    %38 = vector.shape_cast %37 : vector<2x8x32xf32> to vector<16x32xf32>
    %39 = vector.extract_strided_slice %10 {offsets = [0, 32], sizes = [16, 32], strides = [1, 1]} : vector<16x128xf32> to vector<16x32xf32>
    %40 = vector.shape_cast %39 : vector<16x32xf32> to vector<2x8x32xf32>
    %41 = vector.extract_strided_slice %15 {offsets = [0, 32], sizes = [16, 32], strides = [1, 1]} : vector<16x128xf32> to vector<16x32xf32>
    %42 = vector.shape_cast %41 : vector<16x32xf32> to vector<2x8x32xf32>
    %43 = vector.extract_strided_slice %20 {offsets = [0, 32], sizes = [16, 32], strides = [1, 1]} : vector<16x128xf32> to vector<16x32xf32>
    %44 = vector.shape_cast %43 : vector<16x32xf32> to vector<2x8x32xf32>
    "tpu.trace_start"() <{level = 10 : i32, message = "bqd,bkd->bqk"}> : () -> ()
    %cst_26 = arith.constant dense<0.000000e+00> : vector<2x8x8xf32>
    %45 = tpu.matmul %40, %42, %cst_26 {dimension_numbers = #tpu.dot_dimension_numbers<[2], [2], [1], [1], [0, 0, 0, 1, 1, 1], [0], [0]>} : vector<2x8x32xf32>, vector<2x8x32xf32>, vector<2x8x8xf32> -> vector<2x8x8xf32>
    "tpu.trace_stop"() : () -> ()
    %cst_27 = arith.constant dense<0xFF800000> : vector<2x8xf32>
    %46 = vector.multi_reduction <maximumf>, %45, %cst_27 [2] : vector<2x8x8xf32> to vector<2x8xf32>
    %47 = vector.shape_cast %46 : vector<2x8xf32> to vector<2x8x1xf32>
    %48 = vector.broadcast %47 : vector<2x8x1xf32> to vector<2x8x8xf32>
    %49 = arith.subf %45, %48 : vector<2x8x8xf32>
    %50 = math.exp %49 : vector<2x8x8xf32>
    %cst_28 = arith.constant dense<0.000000e+00> : vector<2x8xf32>
    %51 = vector.multi_reduction <add>, %50, %cst_28 [2] : vector<2x8x8xf32> to vector<2x8xf32>
    %52 = vector.shape_cast %51 : vector<2x8xf32> to vector<2x8x1xf32>
    %53 = vector.broadcast %52 : vector<2x8x1xf32> to vector<2x8x8xf32>
    %54 = arith.divf %50, %53 : vector<2x8x8xf32>
    "tpu.trace_start"() <{level = 10 : i32, message = "bqk,bkd->bqd"}> : () -> ()
    %cst_29 = arith.constant dense<0.000000e+00> : vector<2x8x32xf32>
    %55 = tpu.matmul %54, %44, %cst_29 {dimension_numbers = #tpu.dot_dimension_numbers<[2], [1], [1], [2], [0, 0, 0, 1, 1, 2], [0], [0]>} : vector<2x8x8xf32>, vector<2x8x32xf32>, vector<2x8x32xf32> -> vector<2x8x32xf32>
    "tpu.trace_stop"() : () -> ()
    %56 = vector.shape_cast %55 : vector<2x8x32xf32> to vector<16x32xf32>
    %57 = vector.extract_strided_slice %10 {offsets = [0, 64], sizes = [16, 32], strides = [1, 1]} : vector<16x128xf32> to vector<16x32xf32>
    %58 = vector.shape_cast %57 : vector<16x32xf32> to vector<2x8x32xf32>
    %59 = vector.extract_strided_slice %15 {offsets = [0, 64], sizes = [16, 32], strides = [1, 1]} : vector<16x128xf32> to vector<16x32xf32>
    %60 = vector.shape_cast %59 : vector<16x32xf32> to vector<2x8x32xf32>
    %61 = vector.extract_strided_slice %20 {offsets = [0, 64], sizes = [16, 32], strides = [1, 1]} : vector<16x128xf32> to vector<16x32xf32>
    %62 = vector.shape_cast %61 : vector<16x32xf32> to vector<2x8x32xf32>
    "tpu.trace_start"() <{level = 10 : i32, message = "bqd,bkd->bqk"}> : () -> ()
    %cst_30 = arith.constant dense<0.000000e+00> : vector<2x8x8xf32>
    %63 = tpu.matmul %58, %60, %cst_30 {dimension_numbers = #tpu.dot_dimension_numbers<[2], [2], [1], [1], [0, 0, 0, 1, 1, 1], [0], [0]>} : vector<2x8x32xf32>, vector<2x8x32xf32>, vector<2x8x8xf32> -> vector<2x8x8xf32>
    "tpu.trace_stop"() : () -> ()
    %cst_31 = arith.constant dense<0xFF800000> : vector<2x8xf32>
    %64 = vector.multi_reduction <maximumf>, %63, %cst_31 [2] : vector<2x8x8xf32> to vector<2x8xf32>
    %65 = vector.shape_cast %64 : vector<2x8xf32> to vector<2x8x1xf32>
    %66 = vector.broadcast %65 : vector<2x8x1xf32> to vector<2x8x8xf32>
    %67 = arith.subf %63, %66 : vector<2x8x8xf32>
    %68 = math.exp %67 : vector<2x8x8xf32>
    %cst_32 = arith.constant dense<0.000000e+00> : vector<2x8xf32>
    %69 = vector.multi_reduction <add>, %68, %cst_32 [2] : vector<2x8x8xf32> to vector<2x8xf32>
    %70 = vector.shape_cast %69 : vector<2x8xf32> to vector<2x8x1xf32>
    %71 = vector.broadcast %70 : vector<2x8x1xf32> to vector<2x8x8xf32>
    %72 = arith.divf %68, %71 : vector<2x8x8xf32>
    "tpu.trace_start"() <{level = 10 : i32, message = "bqk,bkd->bqd"}> : () -> ()
    %cst_33 = arith.constant dense<0.000000e+00> : vector<2x8x32xf32>
    %73 = tpu.matmul %72, %62, %cst_33 {dimension_numbers = #tpu.dot_dimension_numbers<[2], [1], [1], [2], [0, 0, 0, 1, 1, 2], [0], [0]>} : vector<2x8x8xf32>, vector<2x8x32xf32>, vector<2x8x32xf32> -> vector<2x8x32xf32>
    "tpu.trace_stop"() : () -> ()
    %74 = vector.shape_cast %73 : vector<2x8x32xf32> to vector<16x32xf32>
    %75 = vector.extract_strided_slice %10 {offsets = [0, 96], sizes = [16, 32], strides = [1, 1]} : vector<16x128xf32> to vector<16x32xf32>
    %76 = vector.shape_cast %75 : vector<16x32xf32> to vector<2x8x32xf32>
    %77 = vector.extract_strided_slice %15 {offsets = [0, 96], sizes = [16, 32], strides = [1, 1]} : vector<16x128xf32> to vector<16x32xf32>
    %78 = vector.shape_cast %77 : vector<16x32xf32> to vector<2x8x32xf32>
    %79 = vector.extract_strided_slice %20 {offsets = [0, 96], sizes = [16, 32], strides = [1, 1]} : vector<16x128xf32> to vector<16x32xf32>
    %80 = vector.shape_cast %79 : vector<16x32xf32> to vector<2x8x32xf32>
    "tpu.trace_start"() <{level = 10 : i32, message = "bqd,bkd->bqk"}> : () -> ()
    %cst_34 = arith.constant dense<0.000000e+00> : vector<2x8x8xf32>
    %81 = tpu.matmul %76, %78, %cst_34 {dimension_numbers = #tpu.dot_dimension_numbers<[2], [2], [1], [1], [0, 0, 0, 1, 1, 1], [0], [0]>} : vector<2x8x32xf32>, vector<2x8x32xf32>, vector<2x8x8xf32> -> vector<2x8x8xf32>
    "tpu.trace_stop"() : () -> ()
    %cst_35 = arith.constant dense<0xFF800000> : vector<2x8xf32>
    %82 = vector.multi_reduction <maximumf>, %81, %cst_35 [2] : vector<2x8x8xf32> to vector<2x8xf32>
    %83 = vector.shape_cast %82 : vector<2x8xf32> to vector<2x8x1xf32>
    %84 = vector.broadcast %83 : vector<2x8x1xf32> to vector<2x8x8xf32>
    %85 = arith.subf %81, %84 : vector<2x8x8xf32>
    %86 = math.exp %85 : vector<2x8x8xf32>
    %cst_36 = arith.constant dense<0.000000e+00> : vector<2x8xf32>
    %87 = vector.multi_reduction <add>, %86, %cst_36 [2] : vector<2x8x8xf32> to vector<2x8xf32>
    %88 = vector.shape_cast %87 : vector<2x8xf32> to vector<2x8x1xf32>
    %89 = vector.broadcast %88 : vector<2x8x1xf32> to vector<2x8x8xf32>
    %90 = arith.divf %86, %89 : vector<2x8x8xf32>
    "tpu.trace_start"() <{level = 10 : i32, message = "bqk,bkd->bqd"}> : () -> ()
    %cst_37 = arith.constant dense<0.000000e+00> : vector<2x8x32xf32>
    %91 = tpu.matmul %90, %80, %cst_37 {dimension_numbers = #tpu.dot_dimension_numbers<[2], [1], [1], [2], [0, 0, 0, 1, 1, 2], [0], [0]>} : vector<2x8x8xf32>, vector<2x8x32xf32>, vector<2x8x32xf32> -> vector<2x8x32xf32>
    "tpu.trace_stop"() : () -> ()
    %92 = vector.shape_cast %91 : vector<2x8x32xf32> to vector<16x32xf32>
    %93 = tpu.concatenate %38, %56, %74, %92 in 1 : vector<16x32xf32>, vector<16x32xf32>, vector<16x32xf32>, vector<16x32xf32> -> vector<16x128xf32>
    %c0_38 = arith.constant 0 : index
    %c0_39 = arith.constant 0 : index
    %94 = vector.load %arg9[%c0_38, %c0_39] : memref<128x128xf32, #tpu.memory_space<vmem>>, vector<128x128xf32>
    %cst_40 = arith.constant dense<0.000000e+00> : vector<16x128xf32>
    %95 = tpu.matmul %93, %94, %cst_40 {dimension_numbers = #tpu.dot_dimension_numbers<[1], [0], [0], [1], [0, 0, 1, 1], [], []>} : vector<16x128xf32>, vector<128x128xf32>, vector<16x128xf32> -> vector<16x128xf32>
    %c0_41 = arith.constant 0 : index
    %c0_42 = arith.constant 0 : index
    %96 = vector.load %arg10[%c0_41, %c0_42] : memref<1x128xf32, #tpu.memory_space<vmem>>, vector<1x128xf32>
    %97 = vector.broadcast %96 : vector<1x128xf32> to vector<16x128xf32>
    %98 = arith.addf %95, %97 : vector<16x128xf32>
    %99 = vector.shape_cast %98 : vector<16x128xf32> to vector<2x8x128xf32>
    %100 = tpu.transpose %99, [0, 2, 1] : vector<2x8x128xf32> -> vector<2x128x8xf32>
    %c0_43 = arith.constant 0 : index
    %c0_44 = arith.constant 0 : index
    %c0_45 = arith.constant 0 : index
    %101 = vector.load %arg11[%c0_43, %c0_44, %c0_45] : memref<2x128x8xf32, #tpu.memory_space<vmem>>, vector<2x128x8xf32>
    tpu.vector_store %arg11[%c0_43, %c0_44, %c0_45], %100 {strides = array<i32>} : memref<2x128x8xf32, #tpu.memory_space<vmem>>, vector<2x128x8xf32>,
    return
  }
}

</mosaic_0001>

<bundles_post_ra>
// kernel: tpu_custom_call.1
= control target key start
LH: loop header
LB: loop body
LE: loop exit
PB: predicated region body
PF: predicated region fallthrough
CT: control target
= control target key end

     0   :  { %16 = vsyncpa [#allocation3], 0  ;;  %s2960_s0 = inlined_call_operand.hbm [shape: f32[2,8,128], index: 0, kind: input, shape index: {}]   ;;  %s2961_s1 = inlined_call_operand.hbm [shape: f32[2,8,128], index: 1, kind: input, shape index: {}]   ;;  %s2962_s2 = inlined_call_operand.hbm [shape: f32[2,8,128], index: 2, kind: input, shape index: {}]   ;;  %s2963_s3 = inlined_call_operand.hbm [shape: f32[128,128], index: 3, kind: input, shape index: {}]   ;;  %s2964_s4 = inlined_call_operand.vmem [shape: f32[1,128], index: 4, kind: input, shape index: {}]   ;;  %s2965_s5 = inlined_call_operand.hbm [shape: f32[128,128], index: 5, kind: input, shape index: {}]   ;;  %s2966_s6 = inlined_call_operand.vmem [shape: f32[1,128], index: 6, kind: input, shape index: {}]   ;;  %s2967_s7 = inlined_call_operand.hbm [shape: f32[128,128], index: 7, kind: input, shape index: {}]   ;;  %s2968_s8 = inlined_call_operand.vmem [shape: f32[1,128], index: 8, kind: input, shape index: {}]   ;;  %s2969_s9 = inlined_call_operand.hbm [shape: f32[128,128], index: 9, kind: input, shape index: {}]   ;;  %s2970_s10 = inlined_call_operand.vmem [shape: f32[1,128], index: 10, kind: input, shape index: {}]   ;;  %s2971_s11 = inlined_call_operand.vmem [shape: f32[2,128,8], index: 11, kind: output, shape index: {}]  }
   0x1   :  { %17 = vsyncpa [#allocation5], 0 }
   0x2   :  { %18 = vsyncpa [#allocation8], 0 }
   0x3   :  { %19 = vsyncpa [#allocation11], 0  ;;  %s2542_s17 = smov [#allocation4]   ;;  %s2543_s19 = smov [#allocation7]  }
   0x4   :  { %s37_s18 = sshll.u32 %s2542_s17, 4  ;;  %s61_s20 = sshll.u32 %s2543_s19, 4  ;;  %s38_s18 = int_to_ptr.vmem [resolvable:$true] %s37_s18  ;;  %s62_s20 = int_to_ptr.vmem [resolvable:$true] %s61_s20 }
   0x5   :  { %s2402_s21 = scalar_lea.vmem %s38_s18, 256  ;;  %p2407_p1 = scmp.lt.s32.totalorder %s38_s18, %s38_s18 }
   0x6   :  { %p2403_p0 = scmp.ne.s32.totalorder %s38_s18, %s2402_s21  ;;  %p2408_p2 = scmp.lt.s32.totalorder %s2402_s21, %s2402_s21 }
   0x8   :  { %p2409_p3 = por %p2408_p2, %p2407_p1 }
   0xa   :  { %p2410_p4 = pnand %p2409_p3, %p2403_p0 }
   0xc   :  { %2413 = shalt.err (!%p2410_p4)
}
   0xd   :  { %s2544_s22 = smov 128   ;;  %s2545_s23 = smov 8  }
   0xe   :  { %43 = dma.hbm_to_vmem [thread:$0]  %s2961_s1, 256, %s38_s18, [#allocation5], %s2544_s22, %s2544_s22, %s2545_s23  }
   0xf   :  { %s2422_s26 = scalar_lea.vmem %s62_s20, 2048  ;;  %p2427_p6 = scmp.lt.s32.totalorder %s62_s20, %s62_s20 }
  0x10   :  { %p2423_p5 = scmp.ne.s32.totalorder %s62_s20, %s2422_s26  ;;  %p2428_p7 = scmp.lt.s32.totalorder %s2422_s26, %s2422_s26 }
  0x12   :  { %p2429_p8 = por %p2428_p7, %p2427_p6 }
  0x14   :  { %p2430_p9 = pnand %p2429_p8, %p2423_p5 }
  0x16   :  { %2433 = shalt.err (!%p2430_p9)
}
  0x17   :  { %67 = dma.hbm_to_vmem [thread:$0]  %s2963_s3, 2048, %s62_s20, [#allocation8], %s2544_s22, %s2544_s22, %s2545_s23  }
  0x18   :  { %s2546_s29 = smov [#allocation10]   ;;  %s2547_s12 = smov [#allocation2]  }
  0x19   :  { %s89_s30 = sshll.u32 %s2546_s29, 4  ;;  %s25_s13 = sshll.u32 %s2547_s12, 4  ;;  %s90_s30 = int_to_ptr.vmem [resolvable:$true] %s89_s30  ;;  %s26_s13 = int_to_ptr.vmem [resolvable:$true] %s25_s13 }
  0x1a   :  { %s2442_s1 = scalar_lea.vmem %s90_s30, 2048  ;;  %p2447_p11 = scmp.lt.s32.totalorder %s90_s30, %s90_s30 }
  0x1b   :  { %p2443_p10 = scmp.ne.s32.totalorder %s90_s30, %s2442_s1  ;;  %p2448_p12 = scmp.lt.s32.totalorder %s2442_s1, %s2442_s1 }
  0x1d   :  { %p2449_p13 = por %p2448_p12, %p2447_p11 }
  0x1f   :  { %p2450_p0 = pnand %p2449_p13, %p2443_p10 }
  0x21   :  { %2453 = shalt.err (!%p2450_p0)
}
  0x22   :  { %95 = dma.hbm_to_vmem [thread:$0]  %s2967_s7, 2048, %s90_s30, [#allocation11], %s2544_s22, %s2544_s22, %s2545_s23  }
  0x23   :  { %s2462_s3 = scalar_lea.vmem %s26_s13, 256  ;;  %p2467_p2 = scmp.lt.s32.totalorder %s26_s13, %s26_s13 }
  0x24   :  { %p2463_p1 = scmp.ne.s32.totalorder %s26_s13, %s2462_s3  ;;  %p2468_p3 = scmp.lt.s32.totalorder %s2462_s3, %s2462_s3 }
  0x26   :  { %p2469_p4 = por %p2468_p3, %p2467_p2 }
  0x28   :  { %p2470_p5 = pnand %p2469_p4, %p2463_p1 }
  0x2a   :  { %2473 = shalt.err (!%p2470_p5)
}
  0x2b   :  { %31 = dma.hbm_to_vmem [thread:$0]  %s2960_s0, 256, %s26_s13, [#allocation3], %s2544_s22, %s2544_s22, %s2545_s23  }
  0x2c   :  { %s2548_s18 = smov [#allocation6]   ;;  %s2549_s20 = smov [#allocation9]  }
  0x2d   :  { %s49_s19 = sshll.u32 %s2548_s18, 4  ;;  %s75_s21 = sshll.u32 %s2549_s20, 4  ;;  %s50_s19 = int_to_ptr.vmem [resolvable:$true] %s49_s19  ;;  %s76_s21 = int_to_ptr.vmem [resolvable:$true] %s75_s21 }
  0x2e   :  { %s2482_s7 = scalar_lea.vmem %s50_s19, 256  ;;  %p2487_p7 = scmp.lt.s32.totalorder %s50_s19, %s50_s19 }
  0x2f   :  { %p2483_p6 = scmp.ne.s32.totalorder %s50_s19, %s2482_s7  ;;  %p2488_p8 = scmp.lt.s32.totalorder %s2482_s7, %s2482_s7 }
  0x31   :  { %p2489_p9 = por %p2488_p8, %p2487_p7 }
  0x33   :  { %p2490_p10 = pnand %p2489_p9, %p2483_p6 }
  0x35   :  { %2493 = shalt.err (!%p2490_p10)
}
  0x36   :  { %55 = dma.hbm_to_vmem [thread:$0]  %s2962_s2, 256, %s50_s19, [#allocation5], %s2544_s22, %s2544_s22, %s2545_s23  }
  0x37   :  { %s2502_s0 = scalar_lea.vmem %s76_s21, 2048  ;;  %p2507_p12 = scmp.lt.s32.totalorder %s76_s21, %s76_s21 }
  0x38   :  { %p2503_p11 = scmp.ne.s32.totalorder %s76_s21, %s2502_s0  ;;  %p2508_p13 = scmp.lt.s32.totalorder %s2502_s0, %s2502_s0 }
  0x3a   :  { %p2509_p0 = por %p2508_p13, %p2507_p12 }
  0x3c   :  { %p2510_p1 = pnand %p2509_p0, %p2503_p11 }
  0x3e   :  { %2513 = shalt.err (!%p2510_p1)
}
  0x3f   :  { %81 = dma.hbm_to_vmem [thread:$0]  %s2965_s5, 2048, %s76_s21, [#allocation8], %s2544_s22, %s2544_s22, %s2545_s23  }
  0x40   :  { %s2550_s28 = smov [#allocation12]  }
  0x41   :  { %s103_s29 = sshll.u32 %s2550_s28, 4  ;;  %s104_s29 = int_to_ptr.vmem [resolvable:$true] %s103_s29 }
  0x42   :  { %s2522_s30 = scalar_lea.vmem %s104_s29, 2048  ;;  %p2527_p3 = scmp.lt.s32.totalorder %s104_s29, %s104_s29 }
  0x43   :  { %p2523_p2 = scmp.ne.s32.totalorder %s104_s29, %s2522_s30  ;;  %p2528_p4 = scmp.lt.s32.totalorder %s2522_s30, %s2522_s30 }
  0x45   :  { %p2529_p5 = por %p2528_p4, %p2527_p3 }
  0x47   :  { %p2530_p6 = pnand %p2529_p5, %p2523_p2 }
  0x49   :  { %2533 = shalt.err (!%p2530_p6)
}
  0x4a   :  { %109 = dma.hbm_to_vmem [thread:$0]  %s2969_s9, 2048, %s104_s29, [#allocation11], %s2544_s22, %s2544_s22, %s2545_s23  }
  0x4b   :  { %2534 = dma.done.wait [#allocation3], 256  }
  0x4c   :  { %2535 = vsyncadd [#allocation3], 4294967040 }
  0x4d   :  { %2536 = dma.done.wait [#allocation5], 512  }
  0x4e   :  { %2537 = vsyncadd [#allocation5], 4294966784 }
  0x4f   :  { %2538 = dma.done.wait [#allocation8], 4096  }
  0x50   :  { %2539 = vsyncadd [#allocation8], 4294963200 }
  0x51   :  { %2540 = dma.done.wait [#allocation11], 4096  }
  0x52   :  { %2541 = vsyncadd [#allocation11], 4294963200  ;;  %v154_v0 = vld [vmem:[#allocation7 + $0x78] sm:$0xff]  ;;  %v153_v2 = vld [vmem:[#allocation7 + $0x70] sm:$0xff]  ;;  %v2551_v36 = vmov 0.0   ;;  %vm2552_vm0 = vmmov 0  }
  0x53   :  { %v252_v1 = vld [vmem:[#allocation9 + $0x78] sm:$0xff]  ;;  %2113 = vmatprep.subr.mxu0 %v154_v0  ;;  %v251_v3 = vld [vmem:[#allocation9 + $0x70] sm:$0xff]  ;;  %v152_v4 = vld [vmem:[#allocation7 + $0x68] sm:$0xff]  ;;  %vm433_vm1 = vcmask 261120   ;;  %s2553_s13 = smov 96   ;;  %vm586_vm2 = vcmask 64512  }
  0x54   :  { %2148 = vmatprep.subr.mxu1 %v252_v1  ;;  %2114 = vmatpush3.msra.mxu0 %v154_v0  ;;  %v250_v5 = vld [vmem:[#allocation9 + $0x68] sm:$0xff]  ;;  %v151_v6 = vld [vmem:[#allocation7 + $0x60] sm:$0xff]  ;;  %v150_v8 = vld [vmem:[#allocation7 + $0x58] sm:$0xff]  ;;  %s2555_s1 = smov 32   ;;  %vm1773_vm3 = vcmask 523264   ;;  %vm1776_vm4 = vcmask 785408  }
  0x55   :  { %2149 = vmatpush3.msra.mxu1 %v252_v1  ;;  %2115 = vmatprep.subr.mxu0 %v153_v2  ;;  %v249_v7 = vld [vmem:[#allocation9 + $0x60] sm:$0xff]  ;;  %v248_v9 = vld [vmem:[#allocation9 + $0x58] sm:$0xff]  ;;  %v149_v10 = vld [vmem:[#allocation7 + $0x50] sm:$0xff] }
  0x56   :  { %2150 = vmatprep.subr.mxu1 %v251_v3  ;;  %2116 = vmatpush3.msra.mxu0 %v153_v2  ;;  %v247_v11 = vld [vmem:[#allocation9 + $0x50] sm:$0xff]  ;;  %v148_v12 = vld [vmem:[#allocation7 + $0x48] sm:$0xff]  ;;  %v147_v14 = vld [vmem:[#allocation7 + $0x40] sm:$0xff] }
  0x57   :  { %2151 = vmatpush3.msra.mxu1 %v251_v3  ;;  %2117 = vmatprep.subr.mxu0 %v152_v4  ;;  %v246_v13 = vld [vmem:[#allocation9 + $0x48] sm:$0xff]  ;;  %v245_v15 = vld [vmem:[#allocation9 + $0x40] sm:$0xff]  ;;  %v146_v16 = vld [vmem:[#allocation7 + $0x38] sm:$0xff] }
  0x58   :  { %2152 = vmatprep.subr.mxu1 %v250_v5  ;;  %2118 = vmatpush3.msra.mxu0 %v152_v4  ;;  %v244_v17 = vld [vmem:[#allocation9 + $0x38] sm:$0xff]  ;;  %v145_v18 = vld [vmem:[#allocation7 + $0x30] sm:$0xff]  ;;  %v144_v20 = vld [vmem:[#allocation7 + $0x28] sm:$0xff] }
  0x59   :  { %2153 = vmatpush3.msra.mxu1 %v250_v5  ;;  %2119 = vmatprep.subr.mxu0 %v151_v6  ;;  %v243_v19 = vld [vmem:[#allocation9 + $0x30] sm:$0xff]  ;;  %v242_v21 = vld [vmem:[#allocation9 + $0x28] sm:$0xff]  ;;  %v143_v22 = vld [vmem:[#allocation7 + $0x20] sm:$0xff] }
  0x5a   :  { %2154 = vmatprep.subr.mxu1 %v249_v7  ;;  %2120 = vmatpush3.msra.mxu0 %v151_v6  ;;  %v241_v23 = vld [vmem:[#allocation9 + $0x20] sm:$0xff]  ;;  %v142_v24 = vld [vmem:[#allocation7 + $0x18] sm:$0xff]  ;;  %v141_v26 = vld [vmem:[#allocation7 + $0x10] sm:$0xff] }
  0x5b   :  { %2155 = vmatpush3.msra.mxu1 %v249_v7  ;;  %2121 = vmatprep.subr.mxu0 %v150_v8  ;;  %v240_v25 = vld [vmem:[#allocation9 + $0x18] sm:$0xff]  ;;  %v239_v27 = vld [vmem:[#allocation9 + $0x10] sm:$0xff]  ;;  %v140_v28 = vld [vmem:[#allocation7 + $0x8] sm:$0xff] }
  0x5c   :  { %2156 = vmatprep.subr.mxu1 %v248_v9  ;;  %2122 = vmatpush3.msra.mxu0 %v150_v8  ;;  %v238_v29 = vld [vmem:[#allocation9 + $0x8] sm:$0xff]  ;;  %v139_v30 = vld [vmem:[#allocation7] sm:$0xff]  ;;  %v133_v32 = vld [vmem:[#allocation2] sm:$0xff] }
  0x5d   :  { %2157 = vmatpush3.msra.mxu1 %v248_v9  ;;  %2123 = vmatprep.subr.mxu0 %v149_v10  ;;  %v237_v31 = vld [vmem:[#allocation9] sm:$0xff]  ;;  %v134_v34 = vld [vmem:[#allocation2 + $0x8] sm:$0xff]  ;;  %v136_v35 = vld [vmem:[#allocation4 + $0x8] sm:$0xff] }
  0x5e   :  { %2158 = vmatprep.subr.mxu1 %v247_v11  ;;  %2124 = vmatpush3.msra.mxu0 %v149_v10  ;;  %v135_v33 = vld [vmem:[#allocation4] sm:$0xff]  ;;  %v1981_v38 = vld [vmem:[%s2964_s4] ss:$0 sm:$0xff]  ;;  %v350_v47 = vld [vmem:[#allocation10 + $0x78] sm:$0xff] }
  0x5f   :  { %2159 = vmatpush3.msra.mxu1 %v247_v11  ;;  %2125 = vmatprep.subr.mxu0 %v148_v12  ;;  %v1982_v40 = vld [vmem:[%s2966_s6] ss:$0 sm:$0xff]  ;;  %v348_v49 = vld [vmem:[#allocation10 + $0x68] sm:$0xff]  ;;  %v347_v50 = vld [vmem:[#allocation10 + $0x60] sm:$0xff] }
  0x60   :  { %2160 = vmatprep.subr.mxu1 %v246_v13  ;;  %2126 = vmatpush3.msra.mxu0 %v148_v12  ;;  %v349_v48 = vld [vmem:[#allocation10 + $0x70] sm:$0xff]  ;;  %v346_v52 = vld [vmem:[#allocation10 + $0x58] sm:$0xff]  ;;  %v344_v54 = vld [vmem:[#allocation10 + $0x48] sm:$0xff] }
  0x61   :  { %2161 = vmatpush3.msra.mxu1 %v246_v13  ;;  %2127 = vmatprep.subr.mxu0 %v147_v14  ;;  %v137_v51 = vld [vmem:[#allocation6] sm:$0xff]  ;;  %v343_v55 = vld [vmem:[#allocation10 + $0x40] sm:$0xff]  ;;  %v342_v56 = vld [vmem:[#allocation10 + $0x38] sm:$0xff] }
  0x62   :  { %2162 = vmatprep.subr.mxu1 %v245_v15  ;;  %2128 = vmatpush3.msra.mxu0 %v147_v14  ;;  %v345_v53 = vld [vmem:[#allocation10 + $0x50] sm:$0xff]  ;;  %v340_v58 = vld [vmem:[#allocation10 + $0x28] sm:$0xff]  ;;  %v339_v59 = vld [vmem:[#allocation10 + $0x20] sm:$0xff] }
  0x63   :  { %2163 = vmatpush3.msra.mxu1 %v245_v15  ;;  %2129 = vmatprep.subr.mxu0 %v146_v16  ;;  %v341_v57 = vld [vmem:[#allocation10 + $0x30] sm:$0xff]  ;;  %v338_v60 = vld [vmem:[#allocation10 + $0x18] sm:$0xff]  ;;  %v336_v62 = vld [vmem:[#allocation10 + $0x8] sm:$0xff] }
  0x64   :  { %2164 = vmatprep.subr.mxu1 %v244_v17  ;;  %2130 = vmatpush3.msra.mxu0 %v146_v16  ;;  %v337_v61 = vld [vmem:[#allocation10 + $0x10] sm:$0xff]  ;;  %v335_v63 = vld [vmem:[#allocation10] sm:$0xff]  ;;  %v138_v0 = vld [vmem:[#allocation6 + $0x8] sm:$0xff] }
  0x65   :  { %2165 = vmatpush3.msra.mxu1 %v244_v17  ;;  %2131 = vmatprep.subr.mxu0 %v145_v18 }
  0x66   :  { %2166 = vmatprep.subr.mxu1 %v243_v19  ;;  %2132 = vmatpush3.msra.mxu0 %v145_v18  ;;  %v1983_v18 = vld [vmem:[%s2968_s8] ss:$0 sm:$0xff]  ;;  %s2554_s8 = smov 64  }
  0x67   :  { %2167 = vmatpush3.msra.mxu1 %v243_v19  ;;  %2133 = vmatprep.subr.mxu0 %v144_v20 }
  0x68   :  { %2168 = vmatprep.subr.mxu1 %v242_v21  ;;  %2134 = vmatpush3.msra.mxu0 %v144_v20 }
  0x69   :  { %2169 = vmatpush3.msra.mxu1 %v242_v21  ;;  %2135 = vmatprep.subr.mxu0 %v143_v22 }
  0x6a   :  { %2170 = vmatprep.subr.mxu1 %v241_v23  ;;  %2136 = vmatpush3.msra.mxu0 %v143_v22 }
  0x6b   :  { %2171 = vmatpush3.msra.mxu1 %v241_v23  ;;  %2137 = vmatprep.subr.mxu0 %v142_v24 }
  0x6c   :  { %2172 = vmatprep.subr.mxu1 %v240_v25  ;;  %2138 = vmatpush3.msra.mxu0 %v142_v24 }
  0x6d   :  { %2173 = vmatpush3.msra.mxu1 %v240_v25  ;;  %2139 = vmatprep.subr.mxu0 %v141_v26 }
  0x6e   :  { %2174 = vmatprep.subr.mxu1 %v239_v27  ;;  %2140 = vmatpush3.msra.mxu0 %v141_v26 }
  0x6f   :  { %2175 = vmatpush3.msra.mxu1 %v239_v27  ;;  %2141 = vmatprep.subr.mxu0 %v140_v28 }
  0x70   :  { %2176 = vmatprep.subr.mxu1 %v238_v29  ;;  %2142 = vmatpush3.msra.mxu0 %v140_v28 }
  0x71   :  { %2177 = vmatpush3.msra.mxu1 %v238_v29  ;;  %2143 = vmatprep.subr.mxu0 %v139_v30 }
  0x72   :  { %2178 = vmatprep.subr.mxu1 %v237_v31  ;;  %2144 = vmatpush3.msra.mxu0 %v139_v30 }
  0x73   :  { %2145 = vmatprep.mubr.f32.mxu0 %v133_v32  ;;  %2179 = vmatpush3.msra.mxu1 %v237_v31 }
  0x74   :  { %2180 = vmatprep.mubr.f32.mxu1 %v135_v33  ;;  %2146 = vmatmul.mubr.f32.vlgmr.msra.gmra.mxu0 %v134_v34 }
  0x75   :  { %2181 = vmatmul.mubr.f32.vlgmr.msra.gmra.mxu1 %v136_v35  ;;  %2218 = vmatprep.subr.mxu1 %v2551_v36 }
  0x76   :  { %2220 = vmatprep.mubr.msk.f32.mxu1 %vm2552_vm0, %v2551_v36  ;;  %2183 = vmatprep.subr.mxu0 %v350_v47 }
  0x77   :  { %2184 = vmatpush3.msra.mxu0 %v350_v47  ;;  %2215 = vmatprep.mubr.f32.mxu0 %v137_v51 }
  0x78   :  { %2185 = vmatprep.subr.mxu0 %v349_v48 }
  0x79   :  { %2186 = vmatpush3.msra.mxu0 %v349_v48 }
  0x7a   :  { %2187 = vmatprep.subr.mxu0 %v348_v49 }
  0x7b   :  { %2188 = vmatpush3.msra.mxu0 %v348_v49 }
  0x7c   :  { %2189 = vmatprep.subr.mxu0 %v347_v50 }
  0x7d   :  { %2190 = vmatpush3.msra.mxu0 %v347_v50 }
  0x7e   :  { %2191 = vmatprep.subr.mxu0 %v346_v52 }
  0x7f   :  { %2192 = vmatpush3.msra.mxu0 %v346_v52 }
  0x80   :  { %2193 = vmatprep.subr.mxu0 %v345_v53 }
  0x81   :  { %2194 = vmatpush3.msra.mxu0 %v345_v53 }
  0x82   :  { %2195 = vmatprep.subr.mxu0 %v344_v54 }
  0x83   :  { %2196 = vmatpush3.msra.mxu0 %v344_v54 }
  0x84   :  { %2197 = vmatprep.subr.mxu0 %v343_v55 }
  0x85   :  { %2198 = vmatpush3.msra.mxu0 %v343_v55 }
  0x86   :  { %2199 = vmatprep.subr.mxu0 %v342_v56 }
  0x87   :  { %2200 = vmatpush3.msra.mxu0 %v342_v56 }
  0x88   :  { %2201 = vmatprep.subr.mxu0 %v341_v57 }
  0x89   :  { %2202 = vmatpush3.msra.mxu0 %v341_v57 }
  0x8a   :  { %2203 = vmatprep.subr.mxu0 %v340_v58 }
  0x8b   :  { %2204 = vmatpush3.msra.mxu0 %v340_v58 }
  0x8c   :  { %2205 = vmatprep.subr.mxu0 %v339_v59 }
  0x8d   :  { %2206 = vmatpush3.msra.mxu0 %v339_v59 }
  0x8e   :  { %2207 = vmatprep.subr.mxu0 %v338_v60 }
  0x8f   :  { %2208 = vmatpush3.msra.mxu0 %v338_v60 }
  0x90   :  { %2209 = vmatprep.subr.mxu0 %v337_v61 }
  0x91   :  { %2210 = vmatpush3.msra.mxu0 %v337_v61 }
  0x92   :  { %2211 = vmatprep.subr.mxu0 %v336_v62 }
  0x93   :  { %2212 = vmatpush3.msra.mxu0 %v336_v62 }
  0x94   :  { %2213 = vmatprep.subr.mxu0 %v335_v63 }
  0x95   :  { %2214 = vmatpush3.msra.mxu0 %v335_v63 }
  0x96   :  { %2216 = vmatmul.mubr.f32.vlgmr.msra.gmra.mxu0 %v138_v0 }
 0x134   :  { %v2147_v37 = vpop.f32.mrf.mxu0 }
 0x135   :  { %v2182_v39 = vpop.f32.mrf.mxu1  ;;  %v2684_v46 = vadd.f32 %v2147_v37, %v1981_v38 }
 0x136   :  { %v228_v41 = vpop.f32.mrf.mxu0  ;;  %v2676_v45 = vadd.f32 %v2182_v39, %v1982_v40 }
 0x137   :  { %v326_v42 = vpop.f32.mrf.mxu1  ;;  %v2667_v43 = vadd.f32 %v1981_v38, %v228_v41 }
 0x138   :  { %v2669_v44 = vadd.f32 %v1982_v40, %v326_v42 }
 0x139   :  { %755 = vrot.lane.b32.xlu1 %v2667_v43, %s2553_s13 }
 0x13a   :  { %2219 = vmatpush3.xpose.msk.msra.mxu1 %vm433_vm1, %v2669_v44 }
 0x13b   :  { %2223 = vmatprep.subr.mxu1 %v2551_v36 }
 0x13d   :  { %2221 = vmatmul.mubr.msk.f32.vlgmr.msra.gmra.mxu1 %vm433_vm1, %v2667_v43  ;;  %835 = vrot.lane.b32.xlu1 %v2676_v45, %s2553_s13 }
 0x13e   :  { %2224 = vmatpush3.xpose.msk.msra.mxu1 %vm433_vm1, %v2676_v45  ;;  %2225 = vmatprep.mubr.msk.f32.mxu1 %vm2552_vm0, %v2551_v36 }
 0x13f   :  { %2228 = vmatprep.subr.mxu1 %v2551_v36 }
 0x141   :  { %2226 = vmatmul.mubr.msk.f32.vlgmr.msra.gmra.mxu1 %vm433_vm1, %v2684_v46 }
 0x142   :  { %2230 = vmatprep.mubr.msk.f32.mxu1 %vm2552_vm0, %v2551_v36 }
 0x156   :  { %v2217_v17 = vpop.f32.mrf.mxu0 }
 0x157   :  { %v2702_v19 = vadd.f32 %v2217_v17, %v1983_v18 }
 0x158   :  { %v424_v20 = vpop.f32.mrf.mxu0 }
 0x159   :  { %v2704_v21 = vadd.f32 %v1983_v18, %v424_v20 }
 0x15b   :  { %2229 = vmatpush3.msra.mxu1 %v2704_v21 }
 0x15c   :  { %2233 = vmatprep.subr.mxu1 %v2551_v36 }
 0x1ab   :  { %v756_v22 = vpop.permute.xlu1 %755 }
 0x1af   :  { %v836_v23 = vpop.permute.xlu1 %835 }
 0x1fd   :  { %v506_v1 = vpop.f32.mrf.mxu1 }
 0x1fe   :  { %v587_v2 = vsel %vm586_vm2, %v506_v1, -inf }
 0x1ff   :  { %588 = vmax.xlane.f32.xlu0 %v587_v2  ;;  %v2222_v3 = vpop.f32.mrf.mxu1 }
 0x201   :  { %v582_v4 = vpop.f32.mrf.mxu1 }
 0x202   :  { %v590_v5 = vsel %vm586_vm2, %v582_v4, -inf }
 0x203   :  { %591 = vmax.xlane.f32.xlu0 %v590_v5  ;;  %v2227_v6 = vpop.f32.mrf.mxu1 }
 0x219   :  { %757 = vrot.lane.b32.xlu0 %v2669_v44, %s2553_s13 }
 0x288   :  { %v589_v7 = vpop.xlane.xlu0 %588 }
 0x289   :  { %v593_v8 = vsub.f32 %v506_v1, %v589_v7 }
 0x28b   :  { %v595_v9 = vmul.f32 1.442695, %v593_v8 }
 0x28c   :  { %v592_v10 = vpop.xlane.xlu0 %591 }
 0x28d   :  { %2362 = vpow2.f32 %v595_v9  ;;  %v594_v11 = vsub.f32 %v582_v4, %v592_v10 }
 0x28f   :  { %v597_v12 = vmul.f32 1.442695, %v594_v11 }
 0x290   :  { %v758_v30 = vpop.permute.xlu0 %757 }
 0x291   :  { %2364 = vpow2.f32 %v597_v12 }
 0x29a   :  { %v2363_v13 = vpop.eup %2362 }
 0x29b   :  { %v599_v14 = vsel %vm586_vm2, %v2363_v13, 0.0 }
 0x29c   :  { %600 = vadd.xlane.f32.xlu1 %v599_v14 }
 0x29e   :  { %v2365_v15 = vpop.eup %2364 }
 0x29f   :  { %v602_v16 = vsel %vm586_vm2, %v2365_v15, 0.0 }
 0x2a0   :  { %603 = vadd.xlane.f32.xlu1 %v602_v16 }
 0x2b1   :  { %833 = vrot.lane.b32.xlu1 %v2684_v46, %s2553_s13 }
 0x325   :  { %v601_v24 = vpop.xlane.xlu1 %600 }
 0x326   :  { %2366 = vrcp.f32 %v601_v24 }
 0x329   :  { %v604_v25 = vpop.xlane.xlu1 %603 }
 0x32a   :  { %2368 = vrcp.f32 %v604_v25 }
 0x32d   :  { %v834_v31 = vpop.permute.xlu1 %833 }
 0x333   :  { %v2367_v26 = vpop.eup %2366 }
 0x334   :  { %v606_v27 = vmul.f32 %v2367_v26, %v2363_v13 }
 0x336   :  { %2231 = vmatmul.mubr.msk.f32.vlgmr.msra.gmra.mxu1 %vm586_vm2, %v606_v27 }
 0x337   :  { %v2369_v28 = vpop.eup %2368  ;;  %2234 = vmatpush3.msra.mxu1 %v2702_v19  ;;  %2235 = vmatprep.mubr.msk.f32.mxu1 %vm2552_vm0, %v2551_v36 }
 0x338   :  { %2238 = vmatprep.subr.mxu1 %v2551_v36  ;;  %v608_v29 = vmul.f32 %v2369_v28, %v2365_v15 }
 0x33a   :  { %2236 = vmatmul.mubr.msk.f32.vlgmr.msra.gmra.mxu1 %vm586_vm2, %v608_v29 }
 0x33b   :  { %2239 = vmatpush3.xpose.msk.msra.mxu1 %vm433_vm1, %v758_v30  ;;  %2240 = vmatprep.mubr.msk.f32.mxu1 %vm2552_vm0, %v2551_v36 }
 0x33c   :  { %2243 = vmatprep.subr.mxu1 %v2551_v36 }
 0x33e   :  { %2241 = vmatmul.mubr.msk.f32.vlgmr.msra.gmra.mxu1 %vm433_vm1, %v756_v22 }
 0x33f   :  { %2244 = vmatpush3.xpose.msk.msra.mxu1 %vm433_vm1, %v836_v23  ;;  %2245 = vmatprep.mubr.msk.f32.mxu1 %vm2552_vm0, %v2551_v36 }
 0x340   :  { %2248 = vmatprep.subr.mxu1 %v2551_v36 }
 0x342   :  { %2246 = vmatmul.mubr.msk.f32.vlgmr.msra.gmra.mxu1 %vm433_vm1, %v834_v31 }
 0x343   :  { %2250 = vmatprep.mubr.msk.f32.mxu1 %vm2552_vm0, %v2551_v36 }
 0x3f6   :  { %v2728_v32 = vpop.f32.mrf.mxu1 }
 0x3f8   :  { %v2232_v33 = vpop.f32.mrf.mxu1 }
 0x3fa   :  { %v2730_v34 = vpop.f32.mrf.mxu1 }
 0x3fc   :  { %v2237_v35 = vpop.f32.mrf.mxu1 }
 0x3fe   :  { %v829_v37 = vpop.f32.mrf.mxu1 }
 0x3ff   :  { %v911_v38 = vsel %vm586_vm2, %v829_v37, -inf }
 0x400   :  { %912 = vmax.xlane.f32.xlu0 %v911_v38  ;;  %v2242_v39 = vpop.f32.mrf.mxu1 }
 0x402   :  { %v907_v40 = vpop.f32.mrf.mxu1 }
 0x403   :  { %v914_v41 = vsel %vm586_vm2, %v907_v40, -inf }
 0x404   :  { %915 = vmax.xlane.f32.xlu1 %v914_v41  ;;  %v2247_v42 = vpop.f32.mrf.mxu1 }
 0x415   :  { %1011 = vrot.lane.b32.xlu1 %v2702_v19, %s2553_s13 }
 0x419   :  { %1089 = vrot.lane.b32.xlu1 %v2669_v44, %s2554_s8 }
 0x41d   :  { %1087 = vrot.lane.b32.xlu1 %v2667_v43, %s2554_s8 }
 0x421   :  { %1165 = vrot.lane.b32.xlu1 %v2684_v46, %s2554_s8 }
 0x489   :  { %v913_v47 = vpop.xlane.xlu0 %912 }
 0x48a   :  { %v917_v48 = vsub.f32 %v829_v37, %v913_v47 }
 0x48c   :  { %v919_v49 = vmul.f32 1.442695, %v917_v48 }
 0x48d   :  { %v916_v50 = vpop.xlane.xlu1 %915 }
 0x48e   :  { %2370 = vpow2.f32 %v919_v49  ;;  %v918_v51 = vsub.f32 %v907_v40, %v916_v50 }
 0x490   :  { %v921_v52 = vmul.f32 1.442695, %v918_v51 }
 0x491   :  { %v1012_v60 = vpop.permute.xlu1 %1011 }
 0x492   :  { %2372 = vpow2.f32 %v921_v52 }
 0x495   :  { %v1090_v63 = vpop.permute.xlu1 %1089 }
 0x499   :  { %v1088_v2 = vpop.permute.xlu1 %1087 }
 0x49b   :  { %v2371_v53 = vpop.eup %2370 }
 0x49c   :  { %v923_v54 = vsel %vm586_vm2, %v2371_v53, 0.0 }
 0x49d   :  { %924 = vadd.xlane.f32.xlu0 %v923_v54  ;;  %v1166_v4 = vpop.permute.xlu1 %1165 }
 0x49f   :  { %v2373_v55 = vpop.eup %2372 }
 0x4a0   :  { %v926_v56 = vsel %vm586_vm2, %v2373_v55, 0.0 }
 0x4a1   :  { %927 = vadd.xlane.f32.xlu0 %v926_v56 }
 0x4b7   :  { %934 = vrot.lane.b32.xlu0 %v2704_v21, %s2553_s13 }
 0x4bb   :  { %1167 = vrot.lane.b32.xlu0 %v2676_v45, %s2554_s8 }
 0x526   :  { %v925_v57 = vpop.xlane.xlu0 %924 }
 0x527   :  { %2374 = vrcp.f32 %v925_v57 }
 0x52a   :  { %v928_v58 = vpop.xlane.xlu0 %927 }
 0x52b   :  { %2376 = vrcp.f32 %v928_v58 }
 0x52e   :  { %v935_v59 = vpop.permute.xlu0 %934 }
 0x52f   :  { %2249 = vmatpush3.msra.mxu1 %v935_v59 }
 0x530   :  { %2253 = vmatprep.subr.mxu1 %v2551_v36 }
 0x532   :  { %v1168_v3 = vpop.permute.xlu0 %1167 }
 0x534   :  { %v2375_v61 = vpop.eup %2374 }
 0x535   :  { %v930_v62 = vmul.f32 %v2375_v61, %v2371_v53 }
 0x537   :  { %2251 = vmatmul.mubr.msk.f32.vlgmr.msra.gmra.mxu1 %vm586_vm2, %v930_v62 }
 0x538   :  { %v2377_v0 = vpop.eup %2376  ;;  %2254 = vmatpush3.msra.mxu1 %v1012_v60  ;;  %2255 = vmatprep.mubr.msk.f32.mxu1 %vm2552_vm0, %v2551_v36 }
 0x539   :  { %2258 = vmatprep.subr.mxu1 %v2551_v36  ;;  %v932_v1 = vmul.f32 %v2377_v0, %v2373_v55 }
 0x53b   :  { %2256 = vmatmul.mubr.msk.f32.vlgmr.msra.gmra.mxu1 %vm586_vm2, %v932_v1 }
 0x53c   :  { %2259 = vmatpush3.xpose.msk.msra.mxu1 %vm433_vm1, %v1090_v63  ;;  %2260 = vmatprep.mubr.msk.f32.mxu1 %vm2552_vm0, %v2551_v36 }
 0x53d   :  { %2263 = vmatprep.subr.mxu1 %v2551_v36 }
 0x53f   :  { %2261 = vmatmul.mubr.msk.f32.vlgmr.msra.gmra.mxu1 %vm433_vm1, %v1088_v2 }
 0x540   :  { %2264 = vmatpush3.xpose.msk.msra.mxu1 %vm433_vm1, %v1168_v3  ;;  %2265 = vmatprep.mubr.msk.f32.mxu1 %vm2552_vm0, %v2551_v36 }
 0x541   :  { %2268 = vmatprep.subr.mxu1 %v2551_v36 }
 0x543   :  { %2266 = vmatmul.mubr.msk.f32.vlgmr.msra.gmra.mxu1 %vm433_vm1, %v1166_v4 }
 0x544   :  { %2270 = vmatprep.mubr.msk.f32.mxu1 %vm2552_vm0, %v2551_v36 }
 0x5f7   :  { %v2766_v5 = vpop.f32.mrf.mxu1 }
 0x5f9   :  { %v2252_v6 = vpop.f32.mrf.mxu1 }
 0x5fb   :  { %v2768_v7 = vpop.f32.mrf.mxu1 }
 0x5fc   :  { %v2347_v8 = vpack.i.bf16 %v2768_v7, %v2766_v5  ;;  %v1793_v7 = vld [vmem:[#allocation12 + $0x70] sm:$0xff] }
 0x5fd   :  { %v2257_v9 = vpop.f32.mrf.mxu1 }
 0x5fe   :  { %v1791_v9 = vld [vmem:[#allocation12 + $0x60] sm:$0xff] }
 0x5ff   :  { %v1161_v10 = vpop.f32.mrf.mxu1 }
 0x600   :  { %v1243_v11 = vsel %vm586_vm2, %v1161_v10, -inf }
 0x601   :  { %1244 = vmax.xlane.f32.xlu0 %v1243_v11  ;;  %v2262_v12 = vpop.f32.mrf.mxu1  ;;  %v1789_v11 = vld [vmem:[#allocation12 + $0x50] sm:$0xff] }
 0x602   :  { %v1787_v12 = vld [vmem:[#allocation12 + $0x40] sm:$0xff] }
 0x603   :  { %v1239_v13 = vpop.f32.mrf.mxu1 }
 0x604   :  { %v1246_v14 = vsel %vm586_vm2, %v1239_v13, -inf }
 0x605   :  { %1247 = vmax.xlane.f32.xlu1 %v1246_v14  ;;  %v2267_v15 = vpop.f32.mrf.mxu1  ;;  %v1785_v14 = vld [vmem:[#allocation12 + $0x30] sm:$0xff] }
 0x606   :  { %v1784_v15 = vld [vmem:[#allocation12 + $0x28] sm:$0xff] }
 0x616   :  { %1341 = vrot.lane.b32.xlu1 %v2702_v19, %s2554_s8 }
 0x61a   :  { %1419 = vrot.lane.b32.xlu1 %v2669_v44, %s2555_s1 }
 0x61e   :  { %1417 = vrot.lane.b32.xlu1 %v2667_v43, %s2555_s1 }
 0x622   :  { %1495 = vrot.lane.b32.xlu1 %v2684_v46, %s2555_s1 }
 0x68a   :  { %v1245_v16 = vpop.xlane.xlu0 %1244 }
 0x68b   :  { %v1249_v17 = vsub.f32 %v1161_v10, %v1245_v16  ;;  %v1790_v10 = vld [vmem:[#allocation12 + $0x58] sm:$0xff]  ;;  %v1783_v16 = vld [vmem:[#allocation12 + $0x20] sm:$0xff] }
 0x68d   :  { %v1251_v18 = vmul.f32 1.442695, %v1249_v17  ;;  %v1782_v17 = vld [vmem:[#allocation12 + $0x18] sm:$0xff] }
 0x68e   :  { %v1248_v20 = vpop.xlane.xlu1 %1247 }
 0x68f   :  { %2378 = vpow2.f32 %v1251_v18  ;;  %v1250_v22 = vsub.f32 %v1239_v13, %v1248_v20  ;;  %v1786_v13 = vld [vmem:[#allocation12 + $0x38] sm:$0xff]  ;;  %v1781_v18 = vld [vmem:[#allocation12 + $0x10] sm:$0xff]  ;;  %v1780_v20 = vld [vmem:[#allocation12 + $0x8] sm:$0xff] }
 0x691   :  { %v1253_v23 = vmul.f32 1.442695, %v1250_v22  ;;  %v1779_v22 = vld [vmem:[#allocation12] sm:$0xff] }
 0x692   :  { %v1342_v28 = vpop.permute.xlu1 %1341 }
 0x693   :  { %2380 = vpow2.f32 %v1253_v23 }
 0x696   :  { %v1420_v31 = vpop.permute.xlu1 %1419 }
 0x69a   :  { %v1418_v35 = vpop.permute.xlu1 %1417 }
 0x69c   :  { %v2379_v24 = vpop.eup %2378 }
 0x69d   :  { %v1255_v25 = vsel %vm586_vm2, %v2379_v24, 0.0 }
 0x69e   :  { %1256 = vadd.xlane.f32.xlu0 %v1255_v25  ;;  %v1496_v38 = vpop.permute.xlu1 %1495 }
 0x6a0   :  { %v2381_v26 = vpop.eup %2380 }
 0x6a1   :  { %v1258_v44 = vsel %vm586_vm2, %v2381_v26, 0.0 }
 0x6a2   :  { %1259 = vadd.xlane.f32.xlu0 %v1258_v44 }
 0x6b8   :  { %1265 = vrot.lane.b32.xlu0 %v2704_v21, %s2554_s8 }
 0x6bc   :  { %1497 = vrot.lane.b32.xlu0 %v2676_v45, %s2555_s1 }
 0x727   :  { %v1257_v43 = vpop.xlane.xlu0 %1256 }
 0x728   :  { %2382 = vrcp.f32 %v1257_v43 }
 0x72b   :  { %v1260_v46 = vpop.xlane.xlu0 %1259 }
 0x72c   :  { %2384 = vrcp.f32 %v1260_v46 }
 0x72f   :  { %v1266_v27 = vpop.permute.xlu0 %1265 }
 0x730   :  { %2269 = vmatpush3.msra.mxu1 %v1266_v27 }
 0x731   :  { %2273 = vmatprep.subr.mxu1 %v2551_v36 }
 0x733   :  { %v1498_v37 = vpop.permute.xlu0 %1497 }
 0x735   :  { %v2383_v29 = vpop.eup %2382 }
 0x736   :  { %v1262_v30 = vmul.f32 %v2383_v29, %v2379_v24 }
 0x738   :  { %2271 = vmatmul.mubr.msk.f32.vlgmr.msra.gmra.mxu1 %vm586_vm2, %v1262_v30 }
 0x739   :  { %v2385_v33 = vpop.eup %2384  ;;  %2274 = vmatpush3.msra.mxu1 %v1342_v28  ;;  %2275 = vmatprep.mubr.msk.f32.mxu1 %vm2552_vm0, %v2551_v36 }
 0x73a   :  { %2278 = vmatprep.subr.mxu1 %v2551_v36  ;;  %v1264_v45 = vmul.f32 %v2385_v33, %v2381_v26 }
 0x73c   :  { %2276 = vmatmul.mubr.msk.f32.vlgmr.msra.gmra.mxu1 %vm586_vm2, %v1264_v45 }
 0x73d   :  { %2279 = vmatpush3.xpose.msk.msra.mxu1 %vm433_vm1, %v1420_v31  ;;  %2280 = vmatprep.mubr.msk.f32.mxu1 %vm2552_vm0, %v2551_v36 }
 0x73e   :  { %2283 = vmatprep.subr.mxu1 %v2551_v36 }
 0x740   :  { %2281 = vmatmul.mubr.msk.f32.vlgmr.msra.gmra.mxu1 %vm433_vm1, %v1418_v35 }
 0x741   :  { %2284 = vmatpush3.xpose.msk.msra.mxu1 %vm433_vm1, %v1498_v37  ;;  %2285 = vmatprep.mubr.msk.f32.mxu1 %vm2552_vm0, %v2551_v36 }
 0x742   :  { %2288 = vmatprep.subr.mxu1 %v2551_v36 }
 0x744   :  { %2286 = vmatmul.mubr.msk.f32.vlgmr.msra.gmra.mxu1 %vm433_vm1, %v1496_v38 }
 0x745   :  { %2290 = vmatprep.mubr.msk.f32.mxu1 %vm2552_vm0, %v2551_v36 }
 0x7f8   :  { %v1337_v39 = vpop.f32.mrf.mxu1 }
 0x7fa   :  { %v2272_v40 = vpop.f32.mrf.mxu1 }
 0x7fc   :  { %v1413_v41 = vpop.f32.mrf.mxu1 }
 0x7fd   :  { %v2352_v53 = vpack.i.bf16 %v1413_v41, %v1337_v39 }
 0x7fe   :  { %v2277_v42 = vpop.f32.mrf.mxu1 }
 0x7ff   :  { %v2008_v42 = vld [vmem:[%s2970_s10] ss:$0 sm:$0xff] }
 0x800   :  { %v1491_v47 = vpop.f32.mrf.mxu1 }
 0x801   :  { %v1573_v48 = vsel %vm586_vm2, %v1491_v47, -inf }
 0x802   :  { %1574 = vmax.xlane.f32.xlu0 %v1573_v48  ;;  %v2282_v49 = vpop.f32.mrf.mxu1 }
 0x804   :  { %v1569_v50 = vpop.f32.mrf.mxu1 }
 0x805   :  { %v1576_v51 = vsel %vm586_vm2, %v1569_v50, -inf }
 0x806   :  { %1577 = vmax.xlane.f32.xlu1 %v1576_v51  ;;  %v2287_v52 = vpop.f32.mrf.mxu1 }
 0x817   :  { %1671 = vrot.lane.b32.xlu1 %v2702_v19, %s2555_s1 }
 0x81b   :  { %2348 = vrot.lane.b32.xlu1 %v2347_v8, %s2555_s1  ;;  %v1792_v8 = vld [vmem:[#allocation12 + $0x68] sm:$0xff] }
 0x81f   :  { %2353 = vrot.lane.b32.xlu1 %v2352_v53, %s2554_s8 }
 0x88b   :  { %v1575_v54 = vpop.xlane.xlu0 %1574 }
 0x88c   :  { %v1579_v55 = vsub.f32 %v1491_v47, %v1575_v54 }
 0x88e   :  { %v1581_v56 = vmul.f32 1.442695, %v1579_v55 }
 0x88f   :  { %v1578_v57 = vpop.xlane.xlu1 %1577 }
 0x890   :  { %2386 = vpow2.f32 %v1581_v56  ;;  %v1580_v58 = vsub.f32 %v1569_v50, %v1578_v57 }
 0x892   :  { %v1583_v59 = vmul.f32 1.442695, %v1580_v58 }
 0x893   :  { %v1672_v4 = vpop.permute.xlu1 %1671 }
 0x894   :  { %2388 = vpow2.f32 %v1583_v59 }
 0x897   :  { %v2349_v43 = vpop.permute.xlu1 %2348 }
 0x898   :  { %v2351_v27 = vunpack.i.h.bf16 %v2349_v43  ;;  %v2350_v28 = vunpack.i.l.bf16 %v2349_v43 }
 0x89a   :  { %v1772_v33 = vsel %vm433_vm1, %v2730_v34, %v2351_v27  ;;  %v1771_v37 = vsel %vm433_vm1, %v2728_v32, %v2350_v28 }
 0x89b   :  { %v2354_v46 = vpop.permute.xlu1 %2353 }
 0x89c   :  { %v2356_v29 = vunpack.i.h.bf16 %v2354_v46  ;;  %v2355_v30 = vunpack.i.l.bf16 %v2354_v46 }
 0x89d   :  { %v2387_v60 = vpop.eup %2386 }
 0x89e   :  { %v1585_v61 = vsel %vm586_vm2, %v2387_v60, 0.0  ;;  %v1774_v38 = vsel %vm1773_vm3, %v1771_v37, %v2355_v30  ;;  %v1775_v39 = vsel %vm1773_vm3, %v1772_v33, %v2356_v29 }
 0x89f   :  { %1586 = vadd.xlane.f32.xlu0 %v1585_v61 }
 0x8a1   :  { %v2389_v19 = vpop.eup %2388 }
 0x8a2   :  { %v1588_v62 = vsel %vm586_vm2, %v2389_v19, 0.0 }
 0x8a3   :  { %1589 = vadd.xlane.f32.xlu0 %v1588_v62 }
 0x8b9   :  { %1595 = vrot.lane.b32.xlu0 %v2704_v21, %s2555_s1  ;;  %v1794_v21 = vld [vmem:[#allocation12 + $0x78] sm:$0xff] }
 0x8ba   :  { %2298 = vmatprep.subr.mxu0 %v1794_v21 }
 0x8bb   :  { %2299 = vmatpush3.msra.mxu0 %v1794_v21 }
 0x8bc   :  { %2300 = vmatprep.subr.mxu0 %v1793_v7 }
 0x8bd   :  { %2301 = vmatpush3.msra.mxu0 %v1793_v7 }
 0x8be   :  { %2302 = vmatprep.subr.mxu0 %v1792_v8 }
 0x8bf   :  { %2303 = vmatpush3.msra.mxu0 %v1792_v8 }
 0x8c0   :  { %2304 = vmatprep.subr.mxu0 %v1791_v9 }
 0x8c1   :  { %2305 = vmatpush3.msra.mxu0 %v1791_v9 }
 0x8c2   :  { %2306 = vmatprep.subr.mxu0 %v1790_v10 }
 0x8c3   :  { %2307 = vmatpush3.msra.mxu0 %v1790_v10 }
 0x8c4   :  { %2308 = vmatprep.subr.mxu0 %v1789_v11 }
 0x8c5   :  { %2309 = vmatpush3.msra.mxu0 %v1789_v11 }
 0x928   :  { %v1587_v63 = vpop.xlane.xlu0 %1586 }
 0x929   :  { %2390 = vrcp.f32 %v1587_v63 }
 0x92c   :  { %v1590_v0 = vpop.xlane.xlu0 %1589 }
 0x92d   :  { %2392 = vrcp.f32 %v1590_v0 }
 0x930   :  { %v1596_v1 = vpop.permute.xlu0 %1595 }
 0x931   :  { %2289 = vmatpush3.msra.mxu1 %v1596_v1 }
 0x932   :  { %2293 = vmatprep.subr.mxu1 %v2551_v36 }
 0x936   :  { %v2391_v2 = vpop.eup %2390 }
 0x937   :  { %v1592_v3 = vmul.f32 %v2391_v2, %v2387_v60 }
 0x939   :  { %2291 = vmatmul.mubr.msk.f32.vlgmr.msra.gmra.mxu1 %vm586_vm2, %v1592_v3 }
 0x93a   :  { %v2393_v5 = vpop.eup %2392  ;;  %2294 = vmatpush3.msra.mxu1 %v1672_v4  ;;  %2295 = vmatprep.mubr.msk.f32.mxu1 %vm2552_vm0, %v2551_v36  ;;  %v1788_v36 = vld [vmem:[#allocation12 + $0x48] sm:$0xff] }
 0x93b   :  { %v1594_v6 = vmul.f32 %v2393_v5, %v2389_v19  ;;  %2310 = vmatprep.subr.mxu0 %v1788_v36 }
 0x93c   :  { %2311 = vmatpush3.msra.mxu0 %v1788_v36 }
 0x93d   :  { %2296 = vmatmul.mubr.msk.f32.vlgmr.msra.gmra.mxu1 %vm586_vm2, %v1594_v6  ;;  %2312 = vmatprep.subr.mxu0 %v1787_v12 }
 0x93e   :  { %2313 = vmatpush3.msra.mxu0 %v1787_v12 }
 0x93f   :  { %2314 = vmatprep.subr.mxu0 %v1786_v13 }
 0x940   :  { %2315 = vmatpush3.msra.mxu0 %v1786_v13 }
 0x941   :  { %2316 = vmatprep.subr.mxu0 %v1785_v14 }
 0x942   :  { %2317 = vmatpush3.msra.mxu0 %v1785_v14 }
 0x943   :  { %2318 = vmatprep.subr.mxu0 %v1784_v15 }
 0x944   :  { %2319 = vmatpush3.msra.mxu0 %v1784_v15 }
 0x945   :  { %2320 = vmatprep.subr.mxu0 %v1783_v16 }
 0x946   :  { %2321 = vmatpush3.msra.mxu0 %v1783_v16 }
 0x947   :  { %2322 = vmatprep.subr.mxu0 %v1782_v17 }
 0x948   :  { %2323 = vmatpush3.msra.mxu0 %v1782_v17 }
 0x949   :  { %2324 = vmatprep.subr.mxu0 %v1781_v18 }
 0x94a   :  { %2325 = vmatpush3.msra.mxu0 %v1781_v18 }
 0x94b   :  { %2326 = vmatprep.subr.mxu0 %v1780_v20 }
 0x94c   :  { %2327 = vmatpush3.msra.mxu0 %v1780_v20 }
 0x94d   :  { %2328 = vmatprep.subr.mxu0 %v1779_v22 }
 0x94e   :  { %2329 = vmatpush3.msra.mxu0 %v1779_v22 }
 0x9f9   :  { %v1667_v23 = vpop.f32.mrf.mxu1 }
 0x9fb   :  { %v2292_v24 = vpop.f32.mrf.mxu1 }
 0x9fd   :  { %v1743_v25 = vpop.f32.mrf.mxu1 }
 0x9fe   :  { %v2357_v26 = vpack.i.bf16 %v1743_v25, %v1667_v23 }
 0x9ff   :  { %v2297_v44 = vpop.f32.mrf.mxu1 }
 0xa00   :  { %2358 = vrot.lane.b32.xlu0 %v2357_v26, %s2553_s13 }
 0xa72   :  { %v2359_v31 = vpop.permute.xlu0 %2358 }
 0xa73   :  { %v2361_v45 = vunpack.i.h.bf16 %v2359_v31  ;;  %v2360_v35 = vunpack.i.l.bf16 %v2359_v31 }
 0xa75   :  { %v1777_v40 = vsel %vm1776_vm4, %v1774_v38, %v2360_v35  ;;  %v1778_v41 = vsel %vm1776_vm4, %v1775_v39, %v2361_v45 }
 0xa76   :  { %2330 = vmatprep.mubr.f32.mxu0 %v1777_v40 }
 0xa77   :  { %2331 = vmatmul.mubr.f32.vlgmr.msra.gmra.mxu0 %v1778_v41 }
 0xb37   :  { %v2332_v47 = vpop.f32.mrf.mxu0 }
 0xb38   :  { %v1874_v48 = vadd.f32 %v2332_v47, %v2008_v42 }
 0xb39   :  { %v1868_v49 = vpop.f32.mrf.mxu0 }
 0xb3a   :  { %v1869_v50 = vadd.f32 %v2008_v42, %v1868_v49  ;;  %1909 = vxpose.xlu0.b32.start.end [1/1] (short) %v1874_v48, 128 }
 0xb3c   :  { %1877 = vxpose.xlu1.b32.start.end [1/1] (short) %v1869_v50, 128 }
 0xbb6   :  { %v1925_v34 = vpop.trf.xlu0 }
 0xbb7   :  { %1957 = vst.msk [vmem:[%s2971_s11 + $0x80] sm:$0xff] %vm586_vm2, %v1925_v34 }
 0xbb8   :  { %v1893_v32 = vpop.trf.xlu1 }
 0xbb9   :  { %1941 = vst.msk [vmem:[%s2971_s11] sm:$0xff] %vm586_vm2, %v1893_v32 }
 0xbba   :  { %v1926_v51 = vpop.trf.xlu0 }
 0xbbb   :  { %1958 = vst.msk [vmem:[%s2971_s11 + $0x88] sm:$0xff] %vm586_vm2, %v1926_v51 }
 0xbbc   :  { %v1894_v52 = vpop.trf.xlu1 }
 0xbbd   :  { %1942 = vst.msk [vmem:[%s2971_s11 + $0x8] sm:$0xff] %vm586_vm2, %v1894_v52 }
 0xbbe   :  { %v1927_v53 = vpop.trf.xlu0 }
 0xbbf   :  { %1959 = vst.msk [vmem:[%s2971_s11 + $0x90] sm:$0xff] %vm586_vm2, %v1927_v53 }
 0xbc0   :  { %v1895_v54 = vpop.trf.xlu1 }
 0xbc1   :  { %1943 = vst.msk [vmem:[%s2971_s11 + $0x10] sm:$0xff] %vm586_vm2, %v1895_v54 }
 0xbc2   :  { %v1928_v55 = vpop.trf.xlu0 }
 0xbc3   :  { %1960 = vst.msk [vmem:[%s2971_s11 + $0x98] sm:$0xff] %vm586_vm2, %v1928_v55 }
 0xbc4   :  { %v1896_v56 = vpop.trf.xlu1 }
 0xbc5   :  { %1944 = vst.msk [vmem:[%s2971_s11 + $0x18] sm:$0xff] %vm586_vm2, %v1896_v56 }
 0xbc6   :  { %v1929_v57 = vpop.trf.xlu0 }
 0xbc7   :  { %1961 = vst.msk [vmem:[%s2971_s11 + $0xa0] sm:$0xff] %vm586_vm2, %v1929_v57 }
 0xbc8   :  { %v1897_v58 = vpop.trf.xlu1 }
 0xbc9   :  { %1945 = vst.msk [vmem:[%s2971_s11 + $0x20] sm:$0xff] %vm586_vm2, %v1897_v58 }
 0xbca   :  { %v1930_v59 = vpop.trf.xlu0 }
 0xbcb   :  { %1962 = vst.msk [vmem:[%s2971_s11 + $0xa8] sm:$0xff] %vm586_vm2, %v1930_v59 }
 0xbcc   :  { %v1898_v60 = vpop.trf.xlu1 }
 0xbcd   :  { %1946 = vst.msk [vmem:[%s2971_s11 + $0x28] sm:$0xff] %vm586_vm2, %v1898_v60 }
 0xbce   :  { %v1931_v61 = vpop.trf.xlu0 }
 0xbcf   :  { %1963 = vst.msk [vmem:[%s2971_s11 + $0xb0] sm:$0xff] %vm586_vm2, %v1931_v61 }
 0xbd0   :  { %v1899_v19 = vpop.trf.xlu1 }
 0xbd1   :  { %1947 = vst.msk [vmem:[%s2971_s11 + $0x30] sm:$0xff] %vm586_vm2, %v1899_v19 }
 0xbd2   :  { %v1932_v62 = vpop.trf.xlu0 }
 0xbd3   :  { %1964 = vst.msk [vmem:[%s2971_s11 + $0xb8] sm:$0xff] %vm586_vm2, %v1932_v62 }
 0xbd4   :  { %v1900_v63 = vpop.trf.xlu1 }
 0xbd5   :  { %1948 = vst.msk [vmem:[%s2971_s11 + $0x38] sm:$0xff] %vm586_vm2, %v1900_v63 }
 0xbd6   :  { %v1933_v0 = vpop.trf.xlu0 }
 0xbd7   :  { %1965 = vst.msk [vmem:[%s2971_s11 + $0xc0] sm:$0xff] %vm586_vm2, %v1933_v0 }
 0xbd8   :  { %v1901_v1 = vpop.trf.xlu1 }
 0xbd9   :  { %1949 = vst.msk [vmem:[%s2971_s11 + $0x40] sm:$0xff] %vm586_vm2, %v1901_v1 }
 0xbda   :  { %v1934_v2 = vpop.trf.xlu0 }
 0xbdb   :  { %1966 = vst.msk [vmem:[%s2971_s11 + $0xc8] sm:$0xff] %vm586_vm2, %v1934_v2 }
 0xbdc   :  { %v1902_v3 = vpop.trf.xlu1 }
 0xbdd   :  { %1950 = vst.msk [vmem:[%s2971_s11 + $0x48] sm:$0xff] %vm586_vm2, %v1902_v3 }
 0xbde   :  { %v1935_v4 = vpop.trf.xlu0 }
 0xbdf   :  { %1967 = vst.msk [vmem:[%s2971_s11 + $0xd0] sm:$0xff] %vm586_vm2, %v1935_v4 }
 0xbe0   :  { %v1903_v5 = vpop.trf.xlu1 }
 0xbe1   :  { %1951 = vst.msk [vmem:[%s2971_s11 + $0x50] sm:$0xff] %vm586_vm2, %v1903_v5 }
 0xbe2   :  { %v1936_v6 = vpop.trf.xlu0 }
 0xbe3   :  { %1968 = vst.msk [vmem:[%s2971_s11 + $0xd8] sm:$0xff] %vm586_vm2, %v1936_v6 }
 0xbe4   :  { %v1904_v21 = vpop.trf.xlu1 }
 0xbe5   :  { %1952 = vst.msk [vmem:[%s2971_s11 + $0x58] sm:$0xff] %vm586_vm2, %v1904_v21 }
 0xbe6   :  { %v1937_v7 = vpop.trf.xlu0 }
 0xbe7   :  { %1969 = vst.msk [vmem:[%s2971_s11 + $0xe0] sm:$0xff] %vm586_vm2, %v1937_v7 }
 0xbe8   :  { %v1905_v8 = vpop.trf.xlu1 }
 0xbe9   :  { %1953 = vst.msk [vmem:[%s2971_s11 + $0x60] sm:$0xff] %vm586_vm2, %v1905_v8 }
 0xbea   :  { %v1938_v9 = vpop.trf.xlu0 }
 0xbeb   :  { %1970 = vst.msk [vmem:[%s2971_s11 + $0xe8] sm:$0xff] %vm586_vm2, %v1938_v9 }
 0xbec   :  { %v1906_v10 = vpop.trf.xlu1 }
 0xbed   :  { %1954 = vst.msk [vmem:[%s2971_s11 + $0x68] sm:$0xff] %vm586_vm2, %v1906_v10 }
 0xbee   :  { %v1939_v11 = vpop.trf.xlu0 }
 0xbef   :  { %1971 = vst.msk [vmem:[%s2971_s11 + $0xf0] sm:$0xff] %vm586_vm2, %v1939_v11 }
 0xbf0   :  { %v1907_v36 = vpop.trf.xlu1 }
 0xbf1   :  { %1955 = vst.msk [vmem:[%s2971_s11 + $0x70] sm:$0xff] %vm586_vm2, %v1907_v36 }
 0xbf2   :  { %v1940_v12 = vpop.trf.xlu0 }
 0xbf3   :  { %1972 = vst.msk [vmem:[%s2971_s11 + $0xf8] sm:$0xff] %vm586_vm2, %v1940_v12 }
 0xbf4   :  { %v1908_v13 = vpop.trf.xlu1 }
 0xbf5   :  { %1956 = vst.msk [vmem:[%s2971_s11 + $0x78] sm:$0xff] %vm586_vm2, %v1908_v13 }
 0xbf6   :  { %1977 = vsyncpa [#allocation3], 1 }
 0xbf7   :  { %1978 = vsyncpa [#allocation5], 1 }
 0xbf8   :  { %1979 = vsyncpa [#allocation8], 1 }
 0xbf9   :  { %1980 = vsyncpa [#allocation11], 1 }

</bundles_post_ra>
